<compile_context>
chip_gen: v6e
topology: v6e:2x2x1
jax: 0.10.0
libtpu: 0.0.40
codegen_flags: <defaults>
</compile_context>

<pallas_src>
import jax
import jax.numpy as jnp
from jax.experimental import pallas as pl
from jax.experimental.pallas import tpu as pltpu

LN_EPS = 1e-5  # PyTorch nn.LayerNorm default


# ----------------------------------------------------------------------------
# Fused MLP + LayerNorm kernel
# ----------------------------------------------------------------------------
def _make_encoder_kernel(n_layers: int):
    def kernel(*refs):
        x_ref = refs[0]
        out_ref = refs[-1]
        p = refs[1:-1]          # W0, b0, W1, b1, ..., gamma, beta
        h = x_ref[...].astype(jnp.float32)
        for i in range(n_layers):
            w = p[2 * i][...]
            b = p[2 * i + 1][...]
            h = jnp.dot(h, w, preferred_element_type=jnp.float32) + b
            if i < n_layers - 1:       # ReLU on hidden layers, Identity on last
                h = jnp.maximum(h, 0.0)
        gamma = p[2 * n_layers][...]
        beta = p[2 * n_layers + 1][...]
        mean = jnp.mean(h, axis=-1, keepdims=True)
        var = jnp.mean(jnp.square(h - mean), axis=-1, keepdims=True)
        h = (h - mean) * jax.lax.rsqrt(var + LN_EPS) * gamma + beta
        out_ref[...] = h.astype(out_ref.dtype)

    return kernel


def encoder_apply(x, params, *, row_tile=512):
    """Apply Encoder (MLP + LayerNorm) via one fused Pallas call.

    x: (N, D_in) float32.
    params: {"Ws": [W0, W1, ...], "bs": [...], "gamma": (D_out,), "beta": (D_out,)}
    """
    Ws, bs = params["Ws"], params["bs"]
    n_layers = len(Ws)
    N, D_in = x.shape
    D_out = Ws[-1].shape[1]

    # Row tiling: one big (8-aligned) block for small N, else fixed row tiles.
    if N <= row_tile:
        tile = max(8, ((N + 7) // 8) * 8)
    else:
        tile = row_tile
    grid = (pl.cdiv(N, tile),)   # partial boundary block handled by Pallas

    flat = []
    for w, b in zip(Ws, bs):
        flat.append(w.astype(jnp.float32))
        flat.append(b.reshape(1, -1).astype(jnp.float32))
    flat.append(params["gamma"].reshape(1, -1).astype(jnp.float32))
    flat.append(params["beta"].reshape(1, -1).astype(jnp.float32))

    in_specs = [pl.BlockSpec((tile, D_in), lambda i: (i, 0))]
    for arr in flat:
        # Constant index_map -> parameters stay resident in VMEM across steps.
        in_specs.append(pl.BlockSpec(arr.shape, lambda i: (0, 0)))
    out_spec = pl.BlockSpec((tile, D_out), lambda i: (i, 0))

    out = pl.pallas_call(
        _make_encoder_kernel(n_layers),
        grid=grid,
        in_specs=in_specs,
        out_specs=out_spec,
        out_shape=jax.ShapeDtypeStruct((N, D_out), jnp.float32),
        compiler_params=pltpu.CompilerParams(
            dimension_semantics=("parallel",),   # split rows across v7x TCs
        ),
    )(x, *flat)
    return out


# ----------------------------------------------------------------------------
# Parameter construction (deterministic, matches torch nn.Linear init ranges)
# ----------------------------------------------------------------------------
def _init_linear(key, din, dout):
    k1, k2 = jax.random.split(key)
    lim = 1.0 / (din ** 0.5)
    w = jax.random.uniform(k1, (din, dout), jnp.float32, -lim, lim)
    b = jax.random.uniform(k2, (dout,), jnp.float32, -lim, lim)
    return w, b


def init_encoder_params(key, in_size, hidden_sizes, out_size):
    sizes = [in_size] + list(hidden_sizes) + [out_size]
    keys = jax.random.split(key, len(sizes) - 1)
    Ws, bs = [], []
    for i, k in enumerate(keys):
        w, b = _init_linear(k, sizes[i], sizes[i + 1])
        Ws.append(w)
        bs.append(b)
    return {
        "Ws": Ws,
        "bs": bs,
        "gamma": jnp.ones((out_size,), jnp.float32),
        "beta": jnp.zeros((out_size,), jnp.float32),
    }


# ----------------------------------------------------------------------------
# Pure-JAX reference (for a sanity check only)
# ----------------------------------------------------------------------------
def encoder_ref(x, params):
    h = x
    n = len(params["Ws"])
    for i, (w, b) in enumerate(zip(params["Ws"], params["bs"])):
        h = jnp.dot(h, w, precision=jax.lax.Precision.HIGHEST) + b
        if i < n - 1:
            h = jnp.maximum(h, 0.0)
    mean = jnp.mean(h, axis=-1, keepdims=True)
    var = jnp.mean(jnp.square(h - mean), axis=-1, keepdims=True)
    return (h - mean) * jax.lax.rsqrt(var + LN_EPS) * params["gamma"] + params["beta"]


# ----------------------------------------------------------------------------
if __name__ == "__main__":
    # Encoder config from the module docstring: in_size=30 (2D particle
    # features), latent out_size=128, 2 hidden layers of width 128.
    in_size, out_size = 30, 128
    nmlp_layers, mlp_hidden_dim = 2, 128

    key = jax.random.PRNGKey(0)
    kp, kx1, kx2 = jax.random.split(key, 3)
    params = init_encoder_params(
        kp, in_size, [mlp_hidden_dim] * nmlp_layers, out_size)

    # Small case: single whole-array grid step (rows not a multiple of 8).
    x_small = jax.random.normal(kx1, (60, in_size), jnp.float32)
    y_small = encoder_apply(x_small, params)

    # Larger, non-multiple-of-tile case: exercises partial boundary blocks
    # with a multi-step row grid.
    x_big = jax.random.normal(kx2, (1111, in_size), jnp.float32)
    y_big = encoder_apply(x_big, params)

    jax.block_until_ready((y_small, y_big))

    assert y_small.shape == (60, out_size)
    assert y_big.shape == (1111, out_size)

    ref_small = encoder_ref(x_small, params)
    ref_big = encoder_ref(x_big, params)
    assert float(jnp.max(jnp.abs(y_small - ref_small))) < 1e-2
    assert float(jnp.max(jnp.abs(y_big - ref_big))) < 1e-2

    print("KERNEL_OK")
</pallas_src>

<mosaic_0001>
module attributes {stable_mosaic.version = 11 : i64} {
  func.func @kernel(%arg0: i32, %arg1: memref<64x30xf32, #tpu.memory_space<vmem>>, %arg2: memref<30x128xf32, #tpu.memory_space<vmem>>, %arg3: memref<1x128xf32, #tpu.memory_space<vmem>>, %arg4: memref<128x128xf32, #tpu.memory_space<vmem>>, %arg5: memref<1x128xf32, #tpu.memory_space<vmem>>, %arg6: memref<128x128xf32, #tpu.memory_space<vmem>>, %arg7: memref<1x128xf32, #tpu.memory_space<vmem>>, %arg8: memref<1x128xf32, #tpu.memory_space<vmem>>, %arg9: memref<1x128xf32, #tpu.memory_space<vmem>>, %arg10: memref<64x128xf32, #tpu.memory_space<vmem>>) attributes {dimension_semantics = [#tpu.dimension_semantics<parallel>], iteration_bounds = array<i64: 1>, scalar_prefetch = 0 : i64, scratch_operands = 0 : i64, tpu.core_type = #tpu.core_type<tc>, window_params = [{transform_indices = @transform_0, window_bounds = array<i64: 64, 30>}, {pipeline_mode = #tpu.pipeline_mode<synchronous>, transform_indices = @transform_1, window_bounds = array<i64: 30, 128>}, {pipeline_mode = #tpu.pipeline_mode<synchronous>, transform_indices = @transform_2, window_bounds = array<i64: 1, 128>}, {pipeline_mode = #tpu.pipeline_mode<synchronous>, transform_indices = @transform_3, window_bounds = array<i64: 128, 128>}, {pipeline_mode = #tpu.pipeline_mode<synchronous>, transform_indices = @transform_4, window_bounds = array<i64: 1, 128>}, {pipeline_mode = #tpu.pipeline_mode<synchronous>, transform_indices = @transform_5, window_bounds = array<i64: 128, 128>}, {pipeline_mode = #tpu.pipeline_mode<synchronous>, transform_indices = @transform_6, window_bounds = array<i64: 1, 128>}, {pipeline_mode = #tpu.pipeline_mode<synchronous>, transform_indices = @transform_7, window_bounds = array<i64: 1, 128>}, {pipeline_mode = #tpu.pipeline_mode<synchronous>, transform_indices = @transform_8, window_bounds = array<i64: 1, 128>}, {transform_indices = @transform_9, window_bounds = array<i64: 64, 128>}]} {
    %c0 = arith.constant 0 : index
    %c0_0 = arith.constant 0 : index
    %0 = vector.load %arg1[%c0, %c0_0] : memref<64x30xf32, #tpu.memory_space<vmem>>, vector<64x30xf32>
    %c0_1 = arith.constant 0 : index
    %c0_2 = arith.constant 0 : index
    %1 = vector.load %arg2[%c0_1, %c0_2] : memref<30x128xf32, #tpu.memory_space<vmem>>, vector<30x128xf32>
    %c0_3 = arith.constant 0 : index
    %c0_4 = arith.constant 0 : index
    %2 = vector.load %arg3[%c0_3, %c0_4] : memref<1x128xf32, #tpu.memory_space<vmem>>, vector<1x128xf32>
    %cst = arith.constant dense<0.000000e+00> : vector<64x128xf32>
    %3 = tpu.matmul %0, %1, %cst {dimension_numbers = #tpu.dot_dimension_numbers<[1], [0], [0], [1], [0, 0, 1, 1], [], []>} : vector<64x30xf32>, vector<30x128xf32>, vector<64x128xf32> -> vector<64x128xf32>
    %4 = vector.broadcast %2 : vector<1x128xf32> to vector<64x128xf32>
    %5 = arith.addf %3, %4 : vector<64x128xf32>
    %cst_5 = arith.constant 0.000000e+00 : f32
    %6 = vector.broadcast %cst_5 : f32 to vector<64x128xf32>
    %7 = arith.maximumf %5, %6 : vector<64x128xf32>
    %c0_6 = arith.constant 0 : index
    %c0_7 = arith.constant 0 : index
    %8 = vector.load %arg4[%c0_6, %c0_7] : memref<128x128xf32, #tpu.memory_space<vmem>>, vector<128x128xf32>
    %c0_8 = arith.constant 0 : index
    %c0_9 = arith.constant 0 : index
    %9 = vector.load %arg5[%c0_8, %c0_9] : memref<1x128xf32, #tpu.memory_space<vmem>>, vector<1x128xf32>
    %cst_10 = arith.constant dense<0.000000e+00> : vector<64x128xf32>
    %10 = tpu.matmul %7, %8, %cst_10 {dimension_numbers = #tpu.dot_dimension_numbers<[1], [0], [0], [1], [0, 0, 1, 1], [], []>} : vector<64x128xf32>, vector<128x128xf32>, vector<64x128xf32> -> vector<64x128xf32>
    %11 = vector.broadcast %9 : vector<1x128xf32> to vector<64x128xf32>
    %12 = arith.addf %10, %11 : vector<64x128xf32>
    %cst_11 = arith.constant 0.000000e+00 : f32
    %13 = vector.broadcast %cst_11 : f32 to vector<64x128xf32>
    %14 = arith.maximumf %12, %13 : vector<64x128xf32>
    %c0_12 = arith.constant 0 : index
    %c0_13 = arith.constant 0 : index
    %15 = vector.load %arg6[%c0_12, %c0_13] : memref<128x128xf32, #tpu.memory_space<vmem>>, vector<128x128xf32>
    %c0_14 = arith.constant 0 : index
    %c0_15 = arith.constant 0 : index
    %16 = vector.load %arg7[%c0_14, %c0_15] : memref<1x128xf32, #tpu.memory_space<vmem>>, vector<1x128xf32>
    %cst_16 = arith.constant dense<0.000000e+00> : vector<64x128xf32>
    %17 = tpu.matmul %14, %15, %cst_16 {dimension_numbers = #tpu.dot_dimension_numbers<[1], [0], [0], [1], [0, 0, 1, 1], [], []>} : vector<64x128xf32>, vector<128x128xf32>, vector<64x128xf32> -> vector<64x128xf32>
    %18 = vector.broadcast %16 : vector<1x128xf32> to vector<64x128xf32>
    %19 = arith.addf %17, %18 : vector<64x128xf32>
    %c0_17 = arith.constant 0 : index
    %c0_18 = arith.constant 0 : index
    %20 = vector.load %arg8[%c0_17, %c0_18] : memref<1x128xf32, #tpu.memory_space<vmem>>, vector<1x128xf32>
    %c0_19 = arith.constant 0 : index
    %c0_20 = arith.constant 0 : index
    %21 = vector.load %arg9[%c0_19, %c0_20] : memref<1x128xf32, #tpu.memory_space<vmem>>, vector<1x128xf32>
    %cst_21 = arith.constant dense<0.000000e+00> : vector<64xf32>
    %22 = vector.multi_reduction <add>, %19, %cst_21 [1] : vector<64x128xf32> to vector<64xf32>
    %23 = vector.shape_cast %22 : vector<64xf32> to vector<64x1xf32>
    %cst_22 = arith.constant 1.280000e+02 : f32
    %24 = vector.broadcast %cst_22 : f32 to vector<64x1xf32>
    %25 = arith.divf %23, %24 : vector<64x1xf32>
    %26 = vector.broadcast %25 : vector<64x1xf32> to vector<64x128xf32>
    %27 = arith.subf %19, %26 : vector<64x128xf32>
    %28 = arith.mulf %27, %27 : vector<64x128xf32>
    %cst_23 = arith.constant dense<0.000000e+00> : vector<64xf32>
    %29 = vector.multi_reduction <add>, %28, %cst_23 [1] : vector<64x128xf32> to vector<64xf32>
    %30 = vector.shape_cast %29 : vector<64xf32> to vector<64x1xf32>
    %cst_24 = arith.constant 1.280000e+02 : f32
    %31 = vector.broadcast %cst_24 : f32 to vector<64x1xf32>
    %32 = arith.divf %30, %31 : vector<64x1xf32>
    %33 = vector.broadcast %25 : vector<64x1xf32> to vector<64x128xf32>
    %34 = arith.subf %19, %33 : vector<64x128xf32>
    %cst_25 = arith.constant 9.99999974E-6 : f32
    %35 = vector.broadcast %cst_25 : f32 to vector<64x1xf32>
    %36 = arith.addf %32, %35 : vector<64x1xf32>
    %37 = math.rsqrt %36 : vector<64x1xf32>
    %38 = vector.broadcast %37 : vector<64x1xf32> to vector<64x128xf32>
    %39 = arith.mulf %34, %38 : vector<64x128xf32>
    %40 = vector.broadcast %20 : vector<1x128xf32> to vector<64x128xf32>
    %41 = arith.mulf %39, %40 : vector<64x128xf32>
    %42 = vector.broadcast %21 : vector<1x128xf32> to vector<64x128xf32>
    %43 = arith.addf %41, %42 : vector<64x128xf32>
    %c0_26 = arith.constant 0 : index
    %c0_27 = arith.constant 0 : index
    %44 = vector.load %arg10[%c0_26, %c0_27] : memref<64x128xf32, #tpu.memory_space<vmem>>, vector<64x128xf32>
    tpu.vector_store %arg10[%c0_26, %c0_27], %43 {strides = array<i32>} : memref<64x128xf32, #tpu.memory_space<vmem>>, vector<64x128xf32>,
    return
  }
  func.func @transform_0(%arg0: i32) -> (i32, i32) {
    %c0_i32 = arith.constant 0 : i32
    %c0_i32_0 = arith.constant 0 : i32
    return %arg0, %c0_i32 : i32, i32
  }
  func.func @transform_1(%arg0: i32) -> (i32, i32) {
    %c0_i32 = arith.constant 0 : i32
    %c0_i32_0 = arith.constant 0 : i32
    %c0_i32_1 = arith.constant 0 : i32
    return %c0_i32, %c0_i32_0 : i32, i32
  }
  func.func @transform_2(%arg0: i32) -> (i32, i32) {
    %c0_i32 = arith.constant 0 : i32
    %c0_i32_0 = arith.constant 0 : i32
    %c0_i32_1 = arith.constant 0 : i32
    return %c0_i32, %c0_i32_0 : i32, i32
  }
  func.func @transform_3(%arg0: i32) -> (i32, i32) {
    %c0_i32 = arith.constant 0 : i32
    %c0_i32_0 = arith.constant 0 : i32
    %c0_i32_1 = arith.constant 0 : i32
    return %c0_i32, %c0_i32_0 : i32, i32
  }
  func.func @transform_4(%arg0: i32) -> (i32, i32) {
    %c0_i32 = arith.constant 0 : i32
    %c0_i32_0 = arith.constant 0 : i32
    %c0_i32_1 = arith.constant 0 : i32
    return %c0_i32, %c0_i32_0 : i32, i32
  }
  func.func @transform_5(%arg0: i32) -> (i32, i32) {
    %c0_i32 = arith.constant 0 : i32
    %c0_i32_0 = arith.constant 0 : i32
    %c0_i32_1 = arith.constant 0 : i32
    return %c0_i32, %c0_i32_0 : i32, i32
  }
  func.func @transform_6(%arg0: i32) -> (i32, i32) {
    %c0_i32 = arith.constant 0 : i32
    %c0_i32_0 = arith.constant 0 : i32
    %c0_i32_1 = arith.constant 0 : i32
    return %c0_i32, %c0_i32_0 : i32, i32
  }
  func.func @transform_7(%arg0: i32) -> (i32, i32) {
    %c0_i32 = arith.constant 0 : i32
    %c0_i32_0 = arith.constant 0 : i32
    %c0_i32_1 = arith.constant 0 : i32
    return %c0_i32, %c0_i32_0 : i32, i32
  }
  func.func @transform_8(%arg0: i32) -> (i32, i32) {
    %c0_i32 = arith.constant 0 : i32
    %c0_i32_0 = arith.constant 0 : i32
    %c0_i32_1 = arith.constant 0 : i32
    return %c0_i32, %c0_i32_0 : i32, i32
  }
  func.func @transform_9(%arg0: i32) -> (i32, i32) {
    %c0_i32 = arith.constant 0 : i32
    %c0_i32_0 = arith.constant 0 : i32
    return %arg0, %c0_i32 : i32, i32
  }
}

</mosaic_0001>

<bundles_post_ra>
// kernel: tpu_custom_call.1
= control target key start
LH: loop header
LB: loop body
LE: loop exit
PB: predicated region body
PF: predicated region fallthrough
CT: control target
= control target key end

     0   :  { %14 = vsyncpa [#allocation3], 0  ;;  %s1072_s0 = inlined_call_operand.vmem [shape: f32[60,30], index: 0, kind: input, shape index: {}]   ;;  %s1073_s1 = inlined_call_operand.vmem [shape: f32[30,128], index: 1, kind: input, shape index: {}]   ;;  %s1074_s2 = inlined_call_operand.vmem [shape: f32[1,128], index: 2, kind: input, shape index: {}]   ;;  %s1075_s3 = inlined_call_operand.hbm [shape: f32[128,128], index: 3, kind: input, shape index: {}]   ;;  %s1076_s4 = inlined_call_operand.vmem [shape: f32[1,128], index: 4, kind: input, shape index: {}]   ;;  %s1077_s5 = inlined_call_operand.hbm [shape: f32[128,128], index: 5, kind: input, shape index: {}]   ;;  %s1078_s6 = inlined_call_operand.vmem [shape: f32[1,128], index: 6, kind: input, shape index: {}]   ;;  %s1079_s7 = inlined_call_operand.vmem [shape: f32[1,128], index: 7, kind: input, shape index: {}]   ;;  %s1080_s8 = inlined_call_operand.vmem [shape: f32[1,128], index: 8, kind: input, shape index: {}]   ;;  %s1081_s9 = inlined_call_operand.hbm [shape: f32[60,128], index: 9, kind: output, shape index: {}]  }
   0x1   :  { %15 = vsyncpa [#allocation6], 0 }
   0x2   :  { %16 = vsyncpa [#allocation4], 0  ;;  %s900_s30 = smov [#allocation2]  }
   0x3   :  { %s28_s10 = sshll.u32 %s900_s30, 4  ;;  %s29_s10 = int_to_ptr.vmem [resolvable:$true] %s28_s10 }
   0x4   :  { %s842_s11 = scalar_lea.vmem %s29_s10, 2048  ;;  %p847_p1 = scmp.lt.s32.totalorder %s29_s10, %s29_s10 }
   0x5   :  { %p843_p0 = scmp.ne.s32.totalorder %s29_s10, %s842_s11  ;;  %p848_p2 = scmp.lt.s32.totalorder %s842_s11, %s842_s11 }
   0x7   :  { %p849_p3 = por %p848_p2, %p847_p1 }
   0x9   :  { %p850_p4 = pnand %p849_p3, %p843_p0 }
   0xb   :  { %853 = shalt.err (!%p850_p4)
}
   0xc   :  { %s901_s12 = smov 128   ;;  %s902_s13 = smov 8  }
   0xd   :  { %34 = dma.hbm_to_vmem [thread:$0]  %s1075_s3, 2048, %s29_s10, [#allocation3], %s901_s12, %s901_s12, %s902_s13  }
   0xe   :  { %s903_s16 = smov [#allocation5]  }
   0xf   :  { %s42_s17 = sshll.u32 %s903_s16, 4  ;;  %s43_s17 = int_to_ptr.vmem [resolvable:$true] %s42_s17 }
  0x10   :  { %s862_s18 = scalar_lea.vmem %s43_s17, 2048  ;;  %p867_p6 = scmp.lt.s32.totalorder %s43_s17, %s43_s17 }
  0x11   :  { %p863_p5 = scmp.ne.s32.totalorder %s43_s17, %s862_s18  ;;  %p868_p7 = scmp.lt.s32.totalorder %s862_s18, %s862_s18 }
  0x13   :  { %p869_p8 = por %p868_p7, %p867_p6 }
  0x15   :  { %p870_p9 = pnand %p869_p8, %p863_p5 }
  0x17   :  { %873 = shalt.err (!%p870_p9)
}
  0x18   :  { %48 = dma.hbm_to_vmem [thread:$0]  %s1077_s5, 2048, %s43_s17, [#allocation6], %s901_s12, %s901_s12, %s902_s13  }
  0x19   :  { %894 = dma.done.wait [#allocation3], 2048  }
  0x1a   :  { %895 = vsyncadd [#allocation3], 4294965248 }
  0x1b   :  { %896 = dma.done.wait [#allocation6], 2048  }
  0x1c   :  { %897 = vsyncadd [#allocation6], 4294965248  ;;  %vm105_vm0 = vcmask 1045504   ;;  %vm80_vm1 = vcmask 244736   ;;  %v72_v0 = vld [vmem:[%s1073_s1 + $0x18] sm:$0x3f] }
  0x1d   :  { %v71_v1 = vld [vmem:[%s1073_s1 + $0x10] sm:$0xff]  ;;  %705 = vmatprep.subr.msk.mxu0 %vm105_vm0, %v72_v0  ;;  %v61_v2 = vld [vmem:[%s1072_s0] sm:$0xff]  ;;  %v70_v3 = vld [vmem:[%s1073_s1 + $0x8] sm:$0xff] }
  0x1e   :  { %706 = vmatpush3.msk.msra.mxu0 %vm105_vm0, %v72_v0  ;;  %713 = vmatprep.mubr.msk.f32.mxu0 %vm80_vm1, %v61_v2  ;;  %v69_v4 = vld [vmem:[%s1073_s1] sm:$0xff]  ;;  %v237_v5 = vld [vmem:[#allocation2 + $0x78] sm:$0xff]  ;;  %v236_v6 = vld [vmem:[#allocation2 + $0x70] sm:$0xff] }
  0x1f   :  { %707 = vmatprep.subr.mxu0 %v71_v1  ;;  %725 = vmatprep.subr.mxu1 %v237_v5  ;;  %v62_v7 = vld [vmem:[%s1072_s0 + $0x8] sm:$0xff]  ;;  %v63_v9 = vld [vmem:[%s1072_s0 + $0x10] sm:$0xff]  ;;  %v234_v10 = vld [vmem:[#allocation2 + $0x60] sm:$0xff] }
  0x20   :  { %708 = vmatpush3.msra.mxu0 %v71_v1  ;;  %726 = vmatpush3.msra.mxu1 %v237_v5  ;;  %v235_v8 = vld [vmem:[#allocation2 + $0x68] sm:$0xff]  ;;  %v64_v11 = vld [vmem:[%s1072_s0 + $0x18] sm:$0xff]  ;;  %v65_v13 = vld [vmem:[%s1072_s0 + $0x20] sm:$0xff] }
  0x21   :  { %709 = vmatprep.subr.mxu0 %v70_v3  ;;  %727 = vmatprep.subr.mxu1 %v236_v6  ;;  %v233_v12 = vld [vmem:[#allocation2 + $0x58] sm:$0xff]  ;;  %v232_v14 = vld [vmem:[#allocation2 + $0x50] sm:$0xff]  ;;  %v66_v15 = vld [vmem:[%s1072_s0 + $0x28] sm:$0xff] }
  0x22   :  { %710 = vmatpush3.msra.mxu0 %v70_v3  ;;  %728 = vmatpush3.msra.mxu1 %v236_v6  ;;  %v231_v16 = vld [vmem:[#allocation2 + $0x48] sm:$0xff]  ;;  %v67_v17 = vld [vmem:[%s1072_s0 + $0x30] sm:$0xff]  ;;  %v230_v18 = vld [vmem:[#allocation2 + $0x40] sm:$0xff] }
  0x23   :  { %711 = vmatprep.subr.mxu0 %v69_v4  ;;  %729 = vmatprep.subr.mxu1 %v235_v8  ;;  %v68_v19 = vld [vmem:[%s1072_s0 + $0x38] sm:$0xff]  ;;  %v228_v21 = vld [vmem:[#allocation2 + $0x30] sm:$0xff]  ;;  %v227_v22 = vld [vmem:[#allocation2 + $0x28] sm:$0xff] }
  0x24   :  { %712 = vmatpush3.msra.mxu0 %v69_v4  ;;  %730 = vmatpush3.msra.mxu1 %v235_v8  ;;  %v229_v20 = vld [vmem:[#allocation2 + $0x38] sm:$0xff]  ;;  %v226_v23 = vld [vmem:[#allocation2 + $0x20] sm:$0xff]  ;;  %v224_v25 = vld [vmem:[#allocation2 + $0x10] sm:$0xff] }
  0x25   :  { %714 = vmatmul.mubr.msk.f32.vlgmr.msra.gmra.mxu0 %vm80_vm1, %v62_v7  ;;  %731 = vmatprep.subr.mxu1 %v234_v10  ;;  %v225_v24 = vld [vmem:[#allocation2 + $0x18] sm:$0xff]  ;;  %v223_v26 = vld [vmem:[#allocation2 + $0x8] sm:$0xff]  ;;  %v222_v27 = vld [vmem:[#allocation2] sm:$0xff] }
  0x26   :  { %716 = vmatprep.mubr.msk.f32.mxu0 %vm80_vm1, %v63_v9  ;;  %732 = vmatpush3.msra.mxu1 %v234_v10  ;;  %v373_v28 = vld [vmem:[#allocation5 + $0x78] sm:$0xff]  ;;  %v372_v29 = vld [vmem:[#allocation5 + $0x70] sm:$0xff]  ;;  %v371_v30 = vld [vmem:[#allocation5 + $0x68] sm:$0xff] }
  0x27   :  { %733 = vmatprep.subr.mxu1 %v233_v12  ;;  %769 = vmatprep.subr.mxu0 %v373_v28  ;;  %v370_v31 = vld [vmem:[#allocation5 + $0x60] sm:$0xff]  ;;  %v369_v32 = vld [vmem:[#allocation5 + $0x58] sm:$0xff]  ;;  %v368_v33 = vld [vmem:[#allocation5 + $0x50] sm:$0xff] }
  0x28   :  { %734 = vmatpush3.msra.mxu1 %v233_v12  ;;  %770 = vmatpush3.msra.mxu0 %v373_v28  ;;  %v367_v34 = vld [vmem:[#allocation5 + $0x48] sm:$0xff]  ;;  %v366_v35 = vld [vmem:[#allocation5 + $0x40] sm:$0xff]  ;;  %v365_v36 = vld [vmem:[#allocation5 + $0x38] sm:$0xff] }
  0x29   :  { %717 = vmatmul.mubr.msk.f32.gmra.mxu0 %vm80_vm1, %v64_v11  ;;  %735 = vmatprep.subr.mxu1 %v232_v14  ;;  %v364_v37 = vld [vmem:[#allocation5 + $0x30] sm:$0xff]  ;;  %v363_v38 = vld [vmem:[#allocation5 + $0x28] sm:$0xff]  ;;  %v362_v39 = vld [vmem:[#allocation5 + $0x20] sm:$0xff] }
  0x2a   :  { %719 = vmatprep.mubr.msk.f32.mxu0 %vm80_vm1, %v65_v13  ;;  %736 = vmatpush3.msra.mxu1 %v232_v14  ;;  %v631_v40 = vld [vmem:[%s1074_s2] ss:$0 sm:$0xff]  ;;  %v361_v1 = vld [vmem:[#allocation5 + $0x18] sm:$0xff]  ;;  %v360_v2 = vld [vmem:[#allocation5 + $0x10] sm:$0xff] }
  0x2b   :  { %737 = vmatprep.subr.mxu1 %v231_v16  ;;  %771 = vmatprep.subr.mxu0 %v372_v29  ;;  %v359_v3 = vld [vmem:[#allocation5 + $0x8] sm:$0xff]  ;;  %v358_v4 = vld [vmem:[#allocation5] sm:$0xff] }
  0x2c   :  { %738 = vmatpush3.msra.mxu1 %v231_v16  ;;  %772 = vmatpush3.msra.mxu0 %v372_v29  ;;  %v641_v5 = vld [vmem:[%s1076_s4] ss:$0 sm:$0xff] }
  0x2d   :  { %720 = vmatmul.mubr.msk.f32.gmra.mxu0 %vm80_vm1, %v66_v15  ;;  %739 = vmatprep.subr.mxu1 %v230_v18 }
  0x2e   :  { %722 = vmatprep.mubr.msk.f32.mxu0 %vm80_vm1, %v67_v17  ;;  %740 = vmatpush3.msra.mxu1 %v230_v18 }
  0x2f   :  { %741 = vmatprep.subr.mxu1 %v229_v20  ;;  %773 = vmatprep.subr.mxu0 %v371_v30 }
  0x30   :  { %742 = vmatpush3.msra.mxu1 %v229_v20  ;;  %774 = vmatpush3.msra.mxu0 %v371_v30  ;;  %v642_v30 = vld [vmem:[%s1078_s6] ss:$0 sm:$0xff] }
  0x31   :  { %723 = vmatmul.mubr.msk.f32.gmra.mxu0 %vm80_vm1, %v68_v19  ;;  %743 = vmatprep.subr.mxu1 %v228_v21 }
  0x32   :  { %744 = vmatpush3.msra.mxu1 %v228_v21  ;;  %775 = vmatprep.subr.mxu0 %v370_v31 }
  0x33   :  { %745 = vmatprep.subr.mxu1 %v227_v22  ;;  %776 = vmatpush3.msra.mxu0 %v370_v31 }
  0x34   :  { %746 = vmatpush3.msra.mxu1 %v227_v22  ;;  %777 = vmatprep.subr.mxu0 %v369_v32 }
  0x35   :  { %747 = vmatprep.subr.mxu1 %v226_v23  ;;  %778 = vmatpush3.msra.mxu0 %v369_v32 }
  0x36   :  { %748 = vmatpush3.msra.mxu1 %v226_v23  ;;  %779 = vmatprep.subr.mxu0 %v368_v33 }
  0x37   :  { %749 = vmatprep.subr.mxu1 %v225_v24  ;;  %780 = vmatpush3.msra.mxu0 %v368_v33 }
  0x38   :  { %750 = vmatpush3.msra.mxu1 %v225_v24  ;;  %781 = vmatprep.subr.mxu0 %v367_v34 }
  0x39   :  { %751 = vmatprep.subr.mxu1 %v224_v25  ;;  %782 = vmatpush3.msra.mxu0 %v367_v34 }
  0x3a   :  { %752 = vmatpush3.msra.mxu1 %v224_v25  ;;  %783 = vmatprep.subr.mxu0 %v366_v35 }
  0x3b   :  { %753 = vmatprep.subr.mxu1 %v223_v26  ;;  %784 = vmatpush3.msra.mxu0 %v366_v35 }
  0x3c   :  { %754 = vmatpush3.msra.mxu1 %v223_v26  ;;  %785 = vmatprep.subr.mxu0 %v365_v36 }
  0x3d   :  { %755 = vmatprep.subr.mxu1 %v222_v27  ;;  %786 = vmatpush3.msra.mxu0 %v365_v36 }
  0x3e   :  { %756 = vmatpush3.msra.mxu1 %v222_v27  ;;  %787 = vmatprep.subr.mxu0 %v364_v37 }
  0x3f   :  { %788 = vmatpush3.msra.mxu0 %v364_v37 }
  0x40   :  { %789 = vmatprep.subr.mxu0 %v363_v38 }
  0x41   :  { %790 = vmatpush3.msra.mxu0 %v363_v38 }
  0x42   :  { %791 = vmatprep.subr.mxu0 %v362_v39 }
  0x43   :  { %792 = vmatpush3.msra.mxu0 %v362_v39 }
  0x44   :  { %793 = vmatprep.subr.mxu0 %v361_v1 }
  0x45   :  { %794 = vmatpush3.msra.mxu0 %v361_v1 }
  0x46   :  { %795 = vmatprep.subr.mxu0 %v360_v2 }
  0x47   :  { %796 = vmatpush3.msra.mxu0 %v360_v2 }
  0x48   :  { %797 = vmatprep.subr.mxu0 %v359_v3 }
  0x49   :  { %798 = vmatpush3.msra.mxu0 %v359_v3 }
  0x4a   :  { %799 = vmatprep.subr.mxu0 %v358_v4 }
  0x4b   :  { %800 = vmatpush3.msra.mxu0 %v358_v4 }
  0xe5   :  { %v715_v41 = vpop.f32.mrf.mxu0 }
  0xe6   :  { %v181_v42 = vadd.f32 %v715_v41, %v631_v40 }
  0xe7   :  { %v175_v43 = vpop.f32.mrf.mxu0 }
  0xe8   :  { %v176_v44 = vadd.f32 %v631_v40, %v175_v43  ;;  %v215_v47 = vmax.f32 %v181_v42, 0.0 }
  0xe9   :  { %v718_v45 = vpop.f32.mrf.mxu0 }
  0xea   :  { %v214_v46 = vmax.f32 %v176_v44, 0.0  ;;  %v191_v48 = vadd.f32 %v718_v45, %v631_v40 }
  0xeb   :  { %v185_v49 = vpop.f32.mrf.mxu0 }
  0xec   :  { %v186_v50 = vadd.f32 %v631_v40, %v185_v49  ;;  %757 = vmatprep.mubr.f32.mxu1 %v214_v46  ;;  %v217_v54 = vmax.f32 %v191_v48, 0.0 }
  0xed   :  { %v721_v51 = vpop.f32.mrf.mxu0  ;;  %758 = vmatmul.mubr.f32.vlgmr.msra.gmra.mxu1 %v215_v47 }
  0xee   :  { %v216_v52 = vmax.f32 %v186_v50, 0.0  ;;  %v201_v53 = vadd.f32 %v721_v51, %v631_v40 }
  0xef   :  { %v195_v55 = vpop.f32.mrf.mxu0 }
  0xf0   :  { %v196_v56 = vadd.f32 %v631_v40, %v195_v55  ;;  %760 = vmatprep.mubr.f32.mxu1 %v216_v52  ;;  %v219_v57 = vmax.f32 %v201_v53, 0.0 }
  0xf1   :  { %v724_v58 = vpop.f32.mrf.mxu0  ;;  %761 = vmatmul.mubr.f32.gmra.mxu1 %v217_v54 }
  0xf2   :  { %v218_v59 = vmax.f32 %v196_v56, 0.0  ;;  %v211_v60 = vadd.f32 %v724_v58, %v631_v40 }
  0xf3   :  { %v205_v61 = vpop.f32.mrf.mxu0 }
  0xf4   :  { %v206_v62 = vadd.f32 %v631_v40, %v205_v61  ;;  %763 = vmatprep.mubr.f32.mxu1 %v218_v59  ;;  %v221_v63 = vmax.f32 %v211_v60, 0.0 }
  0xf5   :  { %764 = vmatmul.mubr.f32.gmra.mxu1 %v219_v57 }
  0xf6   :  { %v220_v0 = vmax.f32 %v206_v62, 0.0 }
  0xf8   :  { %766 = vmatprep.mubr.f32.mxu1 %v220_v0 }
  0xf9   :  { %767 = vmatmul.mubr.f32.gmra.mxu1 %v221_v63 }
 0x1ad   :  { %v759_v6 = vpop.f32.mrf.mxu1 }
 0x1ae   :  { %v317_v7 = vadd.f32 %v759_v6, %v641_v5 }
 0x1af   :  { %v311_v8 = vpop.f32.mrf.mxu1 }
 0x1b0   :  { %v312_v9 = vadd.f32 %v641_v5, %v311_v8  ;;  %v351_v12 = vmax.f32 %v317_v7, 0.0 }
 0x1b1   :  { %v762_v10 = vpop.f32.mrf.mxu1 }
 0x1b2   :  { %v350_v11 = vmax.f32 %v312_v9, 0.0  ;;  %v327_v13 = vadd.f32 %v762_v10, %v641_v5 }
 0x1b3   :  { %v321_v14 = vpop.f32.mrf.mxu1 }
 0x1b4   :  { %v322_v15 = vadd.f32 %v641_v5, %v321_v14  ;;  %801 = vmatprep.mubr.f32.mxu0 %v350_v11  ;;  %v353_v18 = vmax.f32 %v327_v13, 0.0 }
 0x1b5   :  { %v765_v16 = vpop.f32.mrf.mxu1  ;;  %802 = vmatmul.mubr.f32.vlgmr.msra.gmra.mxu0 %v351_v12 }
 0x1b6   :  { %v352_v17 = vmax.f32 %v322_v15, 0.0  ;;  %v337_v19 = vadd.f32 %v765_v16, %v641_v5 }
 0x1b7   :  { %v331_v20 = vpop.f32.mrf.mxu1 }
 0x1b8   :  { %v332_v21 = vadd.f32 %v641_v5, %v331_v20  ;;  %804 = vmatprep.mubr.f32.mxu0 %v352_v17  ;;  %v355_v24 = vmax.f32 %v337_v19, 0.0 }
 0x1b9   :  { %v768_v22 = vpop.f32.mrf.mxu1  ;;  %805 = vmatmul.mubr.f32.gmra.mxu0 %v353_v18 }
 0x1ba   :  { %v354_v23 = vmax.f32 %v332_v21, 0.0  ;;  %v347_v25 = vadd.f32 %v768_v22, %v641_v5 }
 0x1bb   :  { %v341_v26 = vpop.f32.mrf.mxu1 }
 0x1bc   :  { %v342_v27 = vadd.f32 %v641_v5, %v341_v26  ;;  %807 = vmatprep.mubr.f32.mxu0 %v354_v23  ;;  %v357_v29 = vmax.f32 %v347_v25, 0.0 }
 0x1bd   :  { %808 = vmatmul.mubr.f32.gmra.mxu0 %v355_v24 }
 0x1be   :  { %v356_v28 = vmax.f32 %v342_v27, 0.0 }
 0x1c0   :  { %810 = vmatprep.mubr.f32.mxu0 %v356_v28 }
 0x1c1   :  { %811 = vmatmul.mubr.f32.gmra.mxu0 %v357_v29 }
 0x275   :  { %v803_v31 = vpop.f32.mrf.mxu0 }
 0x276   :  { %v453_v32 = vadd.f32 %v803_v31, %v642_v30 }
 0x277   :  { %v447_v33 = vpop.f32.mrf.mxu0 }
 0x278   :  { %490 = vadd.xlane.f32.xlu0 %v453_v32  ;;  %v448_v35 = vadd.f32 %v642_v30, %v447_v33 }
 0x279   :  { %v806_v34 = vpop.f32.mrf.mxu0 }
 0x27a   :  { %v463_v36 = vadd.f32 %v806_v34, %v642_v30 }
 0x27b   :  { %v457_v37 = vpop.f32.mrf.mxu0 }
 0x27c   :  { %494 = vadd.xlane.f32.xlu1 %v463_v36  ;;  %488 = vadd.xlane.f32.xlu0 %v448_v35  ;;  %v458_v39 = vadd.f32 %v642_v30, %v457_v37 }
 0x27d   :  { %v809_v38 = vpop.f32.mrf.mxu0 }
 0x27e   :  { %v473_v43 = vadd.f32 %v809_v38, %v642_v30  ;;  %v643_v38 = vld [vmem:[%s1079_s7] ss:$0 sm:$0xff]  ;;  %s904_s7 = smov [#allocation7]  }
 0x27f   :  { %v467_v40 = vpop.f32.mrf.mxu0 }
 0x280   :  { %v468_v41 = vadd.f32 %v642_v30, %v467_v40  ;;  %492 = vadd.xlane.f32.xlu1 %v458_v39 }
 0x281   :  { %v812_v42 = vpop.f32.mrf.mxu0 }
 0x282   :  { %496 = vadd.xlane.f32.xlu0 %v468_v41  ;;  %v483_v46 = vadd.f32 %v812_v42, %v642_v30  ;;  %v644_v42 = vld [vmem:[%s1080_s8] ss:$0 sm:$0xff]  ;;  %s618_s8 = sshll.u32 %s904_s7, 4  ;;  %s619_s8 = int_to_ptr.vmem [resolvable:$true] %s618_s8 }
 0x283   :  { %v477_v44 = vpop.f32.mrf.mxu0  ;;  %s874_s27 = scalar_lea.vmem %s619_s8, 1024  ;;  %p879_p11 = scmp.lt.s32.totalorder %s619_s8, %s619_s8 }
 0x284   :  { %v478_v45 = vadd.f32 %v642_v30, %v477_v44  ;;  %498 = vadd.xlane.f32.xlu1 %v473_v43  ;;  %p875_p10 = scmp.ne.s32.totalorder %s619_s8, %s874_s27  ;;  %p880_p12 = scmp.lt.s32.totalorder %s874_s27, %s874_s27 }
 0x286   :  { %500 = vadd.xlane.f32.xlu0 %v478_v45  ;;  %p881_p13 = por %p880_p12, %p879_p11 }
 0x288   :  { %502 = vadd.xlane.f32.xlu1 %v483_v46  ;;  %p882_p0 = pnand %p881_p13, %p875_p10 }
 0x301   :  { %v491_v47 = vpop.xlane.xlu0 %490 }
 0x302   :  { %v506_v48 = vmul.f32 0.0078125, %v491_v47 }
 0x304   :  { %v1020_v49 = vsub.f32 %v453_v32, %v506_v48 }
 0x305   :  { %v495_v50 = vpop.xlane.xlu1 %494  ;;  %v489_v51 = vpop.xlane.xlu0 %488 }
 0x306   :  { %v508_v52 = vmul.f32 0.0078125, %v495_v50  ;;  %v505_v53 = vmul.f32 0.0078125, %v489_v51  ;;  %v522_v54 = vmul.f32 %v1020_v49, %v1020_v49 }
 0x308   :  { %v1024_v55 = vsub.f32 %v463_v36, %v508_v52  ;;  %v1026_v56 = vsub.f32 %v448_v35, %v505_v53  ;;  %531 = vadd.xlane.f32.xlu1 %v522_v54 }
 0x309   :  { %v493_v57 = vpop.xlane.xlu1 %492 }
 0x30a   :  { %v507_v58 = vmul.f32 0.0078125, %v493_v57  ;;  %v524_v59 = vmul.f32 %v1024_v55, %v1024_v55  ;;  %v521_v60 = vmul.f32 %v1026_v56, %v1026_v56 }
 0x30b   :  { %v497_v61 = vpop.xlane.xlu0 %496 }
 0x30c   :  { %v1032_v62 = vsub.f32 %v458_v39, %v507_v58  ;;  %v509_v63 = vmul.f32 0.0078125, %v497_v61  ;;  %535 = vadd.xlane.f32.xlu1 %v524_v59  ;;  %529 = vadd.xlane.f32.xlu0 %v521_v60 }
 0x30d   :  { %v499_v0 = vpop.xlane.xlu1 %498 }
 0x30e   :  { %v1034_v1 = vsub.f32 %v468_v41, %v509_v63  ;;  %v510_v2 = vmul.f32 0.0078125, %v499_v0  ;;  %v523_v3 = vmul.f32 %v1032_v62, %v1032_v62 }
 0x30f   :  { %v501_v4 = vpop.xlane.xlu0 %500 }
 0x310   :  { %v1038_v5 = vsub.f32 %v473_v43, %v510_v2  ;;  %v511_v6 = vmul.f32 0.0078125, %v501_v4  ;;  %533 = vadd.xlane.f32.xlu0 %v523_v3  ;;  %v525_v11 = vmul.f32 %v1034_v1, %v1034_v1 }
 0x311   :  { %v503_v7 = vpop.xlane.xlu1 %502 }
 0x312   :  { %v1040_v8 = vsub.f32 %v478_v45, %v511_v6  ;;  %v512_v9 = vmul.f32 0.0078125, %v503_v7  ;;  %v526_v10 = vmul.f32 %v1038_v5, %v1038_v5 }
 0x314   :  { %v1046_v12 = vsub.f32 %v483_v46, %v512_v9  ;;  %539 = vadd.xlane.f32.xlu1 %v526_v10  ;;  %537 = vadd.xlane.f32.xlu0 %v525_v11  ;;  %v527_v14 = vmul.f32 %v1040_v8, %v1040_v8 }
 0x316   :  { %v528_v13 = vmul.f32 %v1046_v12, %v1046_v12 }
 0x318   :  { %543 = vadd.xlane.f32.xlu1 %v528_v13  ;;  %541 = vadd.xlane.f32.xlu0 %v527_v14 }
 0x391   :  { %v532_v15 = vpop.xlane.xlu1 %531 }
 0x392   :  { %v546_v16 = vmul.f32 0.0078125, %v532_v15 }
 0x394   :  { %v554_v17 = vadd.f32 1e-05, %v546_v16 }
 0x395   :  { %v536_v18 = vpop.xlane.xlu1 %535  ;;  %v530_v19 = vpop.xlane.xlu0 %529 }
 0x396   :  { %818 = vrsqrt.f32 %v554_v17  ;;  %v548_v20 = vmul.f32 0.0078125, %v536_v18  ;;  %v545_v21 = vmul.f32 0.0078125, %v530_v19 }
 0x398   :  { %v556_v22 = vadd.f32 1e-05, %v548_v20  ;;  %v553_v23 = vadd.f32 1e-05, %v545_v21 }
 0x399   :  { %v534_v24 = vpop.xlane.xlu0 %533 }
 0x39a   :  { %820 = vrsqrt.f32 %v556_v22  ;;  %v547_v25 = vmul.f32 0.0078125, %v534_v24 }
 0x39b   :  { %822 = vrsqrt.f32 %v553_v23 }
 0x39c   :  { %v555_v26 = vadd.f32 1e-05, %v547_v25 }
 0x39d   :  { %v540_v27 = vpop.xlane.xlu1 %539  ;;  %v538_v28 = vpop.xlane.xlu0 %537 }
 0x39e   :  { %824 = vrsqrt.f32 %v555_v26  ;;  %v550_v29 = vmul.f32 0.0078125, %v540_v27  ;;  %v549_v30 = vmul.f32 0.0078125, %v538_v28 }
 0x3a0   :  { %v558_v31 = vadd.f32 1e-05, %v550_v29  ;;  %v557_v32 = vadd.f32 1e-05, %v549_v30 }
 0x3a1   :  { %v544_v33 = vpop.xlane.xlu1 %543  ;;  %v542_v34 = vpop.xlane.xlu0 %541 }
 0x3a2   :  { %826 = vrsqrt.f32 %v558_v31  ;;  %v552_v35 = vmul.f32 0.0078125, %v544_v33  ;;  %v551_v36 = vmul.f32 0.0078125, %v542_v34 }
 0x3a3   :  { %v819_v37 = vpop.eup %818  ;;  %828 = vrsqrt.f32 %v557_v32 }
 0x3a4   :  { %v570_v39 = vmul.f32 %v819_v37, %v1020_v49  ;;  %v560_v40 = vadd.f32 1e-05, %v552_v35  ;;  %v559_v41 = vadd.f32 1e-05, %v551_v36 }
 0x3a6   :  { %v584_v43 = vmul.f32 %v643_v38, %v570_v39  ;;  %830 = vrsqrt.f32 %v560_v40 }
 0x3a7   :  { %v821_v44 = vpop.eup %820  ;;  %832 = vrsqrt.f32 %v559_v41 }
 0x3a8   :  { %v823_v45 = vpop.eup %822  ;;  %v598_v46 = vadd.f32 %v644_v42, %v584_v43  ;;  %v572_v47 = vmul.f32 %v821_v44, %v1024_v55 }
 0x3a9   :  { %v569_v48 = vmul.f32 %v823_v45, %v1026_v56 }
 0x3aa   :  { %606 = vst [vmem:[#allocation7 + $0x8] sm:$0xff] %v598_v46  ;;  %v586_v50 = vmul.f32 %v643_v38, %v572_v47 }
 0x3ab   :  { %v825_v51 = vpop.eup %824  ;;  %v583_v49 = vmul.f32 %v643_v38, %v569_v48 }
 0x3ac   :  { %v600_v52 = vadd.f32 %v644_v42, %v586_v50  ;;  %v571_v53 = vmul.f32 %v825_v51, %v1032_v62 }
 0x3ad   :  { %v597_v54 = vadd.f32 %v644_v42, %v583_v49 }
 0x3ae   :  { %608 = vst [vmem:[#allocation7 + $0x18] sm:$0xff] %v600_v52  ;;  %v585_v57 = vmul.f32 %v643_v38, %v571_v53 }
 0x3af   :  { %v827_v58 = vpop.eup %826  ;;  %605 = vst [vmem:[#allocation7] sm:$0xff] %v597_v54 }
 0x3b0   :  { %v829_v59 = vpop.eup %828  ;;  %v599_v60 = vadd.f32 %v644_v42, %v585_v57  ;;  %v574_v61 = vmul.f32 %v827_v58, %v1038_v5 }
 0x3b1   :  { %v573_v55 = vmul.f32 %v829_v59, %v1034_v1 }
 0x3b2   :  { %607 = vst [vmem:[#allocation7 + $0x10] sm:$0xff] %v599_v60  ;;  %v588_v56 = vmul.f32 %v643_v38, %v574_v61 }
 0x3b3   :  { %v831_v63 = vpop.eup %830  ;;  %v587_v0 = vmul.f32 %v643_v38, %v573_v55 }
 0x3b4   :  { %v833_v2 = vpop.eup %832  ;;  %v602_v3 = vadd.f32 %v644_v42, %v588_v56  ;;  %v576_v4 = vmul.f32 %v831_v63, %v1046_v12 }
 0x3b5   :  { %v601_v62 = vadd.f32 %v644_v42, %v587_v0  ;;  %v575_v6 = vmul.f32 %v833_v2, %v1040_v8 }
 0x3b6   :  { %610 = vst [vmem:[#allocation7 + $0x28] sm:$0xff] %v602_v3  ;;  %v590_v7 = vmul.f32 %v643_v38, %v576_v4 }
 0x3b7   :  { %609 = vst [vmem:[#allocation7 + $0x20] sm:$0xff] %v601_v62  ;;  %v589_v9 = vmul.f32 %v643_v38, %v575_v6 }
 0x3b8   :  { %v604_v5 = vadd.f32 %v644_v42, %v590_v7 }
 0x3b9   :  { %v603_v10 = vadd.f32 %v644_v42, %v589_v9 }
 0x3ba   :  { %612 = vst [vmem:[#allocation7 + $0x38] sm:$0xff] %v604_v5 }
 0x3bb   :  { %611 = vst [vmem:[#allocation7 + $0x30] sm:$0xff] %v603_v10 }
 0x3bc   :  { %885 = shalt.err (!%p882_p0)
}
 0x3bd   :  { %624 = dma.vmem_to_hbm [thread:$0]  %s619_s8, 1024, %s1081_s9, [#allocation4], %s901_s12, %s901_s12, %s902_s13  }
 0x3be   :  { %898 = dma.done.wait [#allocation4], 1024  }
 0x3bf   :  { %899 = vsyncadd [#allocation4], 4294966272 }
 0x3c0   :  { %628 = vsyncpa [#allocation3], 1 }
 0x3c1   :  { %629 = vsyncpa [#allocation6], 1 }
 0x3c2   :  { %630 = vsyncpa [#allocation4], 1 }

</bundles_post_ra>
